<compile_context>
chip_gen: v7x
topology: tpu7x:2x2x1
jax: 0.10.0
libtpu: 0.0.40
codegen_flags: <defaults>
</compile_context>

<pallas_src>
import functools

import jax
import jax.numpy as jnp
from jax.experimental import pallas as pl
from jax.experimental.pallas import tpu as pltpu


def _vpu_loss_kernel(inp_ref, tgt_ref, out_ref, *, gamma, alpha, positive_label):
    x = inp_ref[...].astype(jnp.float32)        # (N, TC)
    t = tgt_ref[...].astype(jnp.float32)        # (N, TC)
    n = x.shape[0]
    inv_n = 1.0 / n

    # ---- per-class std (single pass: var = E[x^2] - E[x]^2), detached/clipped ----
    sum_x = jnp.sum(x, axis=0, keepdims=True)                       # (1, TC)
    sum_x2 = jnp.sum(x * x, axis=0, keepdims=True)                  # (1, TC)
    mean = sum_x * inv_n
    var = jnp.maximum(sum_x2 * inv_n - mean * mean, 0.0)
    std = alpha * jnp.sqrt(var)
    std = jnp.where(std > 1.0, 1.0, std)
    # Guard against std == 0 (constant column): torch would produce inf/nan here.
    std = jnp.where(std > 0.0, std, 1.0)

    # ---- positive mask & per-class counts (unlabeled == ones -> count == N) ----
    positive = (t == positive_label).astype(jnp.float32)            # (N, TC)
    num_p = jnp.sum(positive, axis=0, keepdims=True)                # (1, TC)
    num_p_rec = jnp.where(num_p == 0.0, 0.0, 1.0 / num_p)
    num_x_rec = inv_n

    # ---- log-sigmoid of variance-scaled logits ----
    sig = jax.nn.sigmoid(x * (1.0 / std))                           # (N, TC)
    out_all_log = jnp.log(sig + 1e-10)                              # (N, TC)

    # ---- p-loss per class: sum_n(log sig * positive) / num_p ----
    p_per_class = jnp.sum(out_all_log * positive, axis=0, keepdims=True) * num_p_rec

    # ---- u-loss per class ----
    sum_sig = jnp.sum(sig, axis=0, keepdims=True)                   # (1, TC)
    # pt1 = mean(1 - sig); one-sided focal weight (1 - pt1)^gamma (no-grad in torch)
    pt1 = (n - sum_sig) * num_x_rec
    base = 1.0 - pt1
    if float(gamma) == 2.0:
        one_sided_w_n = base * base
    else:
        one_sided_w_n = jnp.exp(gamma * jnp.log(base))
    # sum_n exp(out_x_log) == sum_n (sig + 1e-10) == sum_sig + n * 1e-10
    u_per_class = jnp.log((sum_sig + n * 1e-10) * num_x_rec + 1e-10) * one_sided_w_n

    out_ref[...] = u_per_class - p_per_class                        # (1, TC)


def _choose_class_tile(n, c, vmem_budget_bytes=16 * 1024 * 1024):
    """Largest class-tile that is a multiple of 128, divides C, and keeps the
    double-buffered input working set inside a conservative VMEM budget
    (safe on v7x's 64 MiB physical / 32 MiB default scoped VMEM)."""
    if c % 128 != 0:
        return c  # small / odd C: take the whole array (block == full dims)
    per_col_bytes = 2 * 2 * n * 4  # 2 inputs x 2 pipeline buffers x N rows x f32
    max_tc = max(128, (vmem_budget_bytes // per_col_bytes) // 128 * 128)
    tc = min(c, max_tc, 2048)
    while c % tc != 0:
        tc -= 128
    return tc


def vpu_loss(inp, target, *, gamma=2.0, alpha=0.5, positive_label=1.0, class_tile=None):
    """Pallas forward pass of vpuLoss.

    inp:    (N, C) logits (any float dtype; cast to f32 inside the kernel).
    target: (N, C) labels in {-1, 0, 1} (any numeric dtype).
    Returns f32 scalar loss.
    """
    n, c = inp.shape
    assert target.shape == (n, c)
    tc = class_tile if class_tile is not None else _choose_class_tile(n, c)
    assert c % tc == 0, f"class tile {tc} must divide C={c}"
    grid = (c // tc,)

    kernel = functools.partial(
        _vpu_loss_kernel,
        gamma=float(gamma),
        alpha=float(alpha),
        positive_label=float(positive_label),
    )
    per_class = pl.pallas_call(
        kernel,
        out_shape=jax.ShapeDtypeStruct((1, c), jnp.float32),
        grid=grid,
        in_specs=[
            pl.BlockSpec((n, tc), lambda i: (0, i)),
            pl.BlockSpec((n, tc), lambda i: (0, i)),
        ],
        out_specs=pl.BlockSpec((1, tc), lambda i: (0, i)),
        compiler_params=pltpu.CompilerParams(
            dimension_semantics=("parallel",),
        ),
    )(inp, target)
    # Tiny final reduction over classes (kept outside so the grid stays parallel).
    return jnp.sum(per_class)


def vpu_loss_ref(inp, target, *, gamma=2.0, alpha=0.5, positive_label=1.0):
    """Plain-JAX reference mirroring the PyTorch module line by line."""
    inp = inp.astype(jnp.float32)
    target = target.astype(jnp.float32)
    n = inp.shape[0]
    mean = jnp.mean(inp, axis=0)
    std = alpha * jnp.sqrt(jnp.sum((inp - mean) ** 2, axis=0) / n)
    std = jnp.where(std > 1.0, 1.0, std)
    positive = (target == positive_label).astype(jnp.float32)
    unlabeled = jnp.ones_like(positive)
    num_p_rec = jnp.sum(positive, axis=0) ** -1.0
    num_x_rec = jnp.sum(unlabeled, axis=0) ** -1.0
    num_p_rec = jnp.where(jnp.isinf(num_p_rec), 0.0, num_p_rec)
    num_x_rec = jnp.where(jnp.isinf(num_x_rec), 0.0, num_x_rec)
    out_all_log = jnp.log(jax.nn.sigmoid(inp * std ** -1.0) + 1e-10)
    out_p_log = out_all_log * positive
    out_x_log = out_all_log * unlabeled
    out_all_sig = jax.nn.sigmoid(inp * std ** -1.0)
    pt1 = jnp.sum((1.0 - out_all_sig) * unlabeled, axis=0) * num_x_rec
    one_sided_w_n = (1.0 - pt1) ** gamma
    p_loss = jnp.sum(jnp.log(jnp.exp(out_p_log) + 1e-10) * num_p_rec)
    u_loss = jnp.sum(
        jnp.log(jnp.sum(jnp.exp(out_x_log), axis=0) * num_x_rec + 1e-10) * one_sided_w_n
    )
    return u_loss - p_loss


if __name__ == "__main__":
    N, C = 8, 256            # batch on sublanes, classes on lanes (2 tiles of 128)
    GAMMA, ALPHA = 2.0, 0.5

    key = jax.random.PRNGKey(0)
    k_inp, k_tgt = jax.random.split(key)
    inp = jax.random.normal(k_inp, (N, C), dtype=jnp.float32) * 2.0
    # targets in {-1 (negative), 0 (unlabeled), 1 (positive)}
    target = jax.random.randint(k_tgt, (N, C), -1, 2).astype(jnp.float32)

    # class_tile=128 -> grid=(2,) to exercise the tiled / parallel path.
    loss = vpu_loss(inp, target, gamma=GAMMA, alpha=ALPHA, class_tile=128)
    loss = jax.block_until_ready(loss)

    ref = vpu_loss_ref(inp, target, gamma=GAMMA, alpha=ALPHA)
    ref = jax.block_until_ready(ref)

    assert jnp.allclose(loss, ref, rtol=1e-4, atol=1e-4), (loss, ref)
    print("KERNEL_OK")
</pallas_src>

<mosaic_0001>
module attributes {stable_mosaic.version = 11 : i64} {
  func.func @_vpu_loss_kernel(%arg0: i32, %arg1: memref<8x128xf32, #tpu.memory_space<vmem>>, %arg2: memref<8x128xf32, #tpu.memory_space<vmem>>, %arg3: memref<1x128xf32, #tpu.memory_space<vmem>>) attributes {dimension_semantics = [#tpu.dimension_semantics<parallel>], iteration_bounds = array<i64: 2>, scalar_prefetch = 0 : i64, scratch_operands = 0 : i64, tpu.core_type = #tpu.core_type<tc>, window_params = [{transform_indices = @transform_0, window_bounds = array<i64: 8, 128>}, {transform_indices = @transform_1, window_bounds = array<i64: 8, 128>}, {transform_indices = @transform_2, window_bounds = array<i64: 1, 128>}]} {
    %c0 = arith.constant 0 : index
    %c0_0 = arith.constant 0 : index
    %0 = vector.load %arg1[%c0, %c0_0] : memref<8x128xf32, #tpu.memory_space<vmem>>, vector<8x128xf32>
    %c0_1 = arith.constant 0 : index
    %c0_2 = arith.constant 0 : index
    %1 = vector.load %arg2[%c0_1, %c0_2] : memref<8x128xf32, #tpu.memory_space<vmem>>, vector<8x128xf32>
    %cst = arith.constant dense<0.000000e+00> : vector<128xf32>
    %2 = vector.multi_reduction <add>, %0, %cst [0] : vector<8x128xf32> to vector<128xf32>
    %3 = vector.shape_cast %2 : vector<128xf32> to vector<1x128xf32>
    %4 = arith.mulf %0, %0 : vector<8x128xf32>
    %cst_3 = arith.constant dense<0.000000e+00> : vector<128xf32>
    %5 = vector.multi_reduction <add>, %4, %cst_3 [0] : vector<8x128xf32> to vector<128xf32>
    %6 = vector.shape_cast %5 : vector<128xf32> to vector<1x128xf32>
    %cst_4 = arith.constant 1.250000e-01 : f32
    %7 = vector.broadcast %cst_4 : f32 to vector<1x128xf32>
    %8 = arith.mulf %3, %7 : vector<1x128xf32>
    %cst_5 = arith.constant 1.250000e-01 : f32
    %9 = vector.broadcast %cst_5 : f32 to vector<1x128xf32>
    %10 = arith.mulf %6, %9 : vector<1x128xf32>
    %11 = arith.mulf %8, %8 : vector<1x128xf32>
    %12 = arith.subf %10, %11 : vector<1x128xf32>
    %cst_6 = arith.constant 0.000000e+00 : f32
    %13 = vector.broadcast %cst_6 : f32 to vector<1x128xf32>
    %14 = arith.maximumf %12, %13 : vector<1x128xf32>
    %15 = math.sqrt %14 : vector<1x128xf32>
    %cst_7 = arith.constant 5.000000e-01 : f32
    %16 = vector.broadcast %cst_7 : f32 to vector<1x128xf32>
    %17 = arith.mulf %16, %15 : vector<1x128xf32>
    %cst_8 = arith.constant 1.000000e+00 : f32
    %18 = vector.broadcast %cst_8 : f32 to vector<1x128xf32>
    %19 = arith.cmpf ogt, %17, %18 : vector<1x128xf32>
    %cst_9 = arith.constant 1.000000e+00 : f32
    %20 = vector.broadcast %cst_9 : f32 to vector<1x128xf32>
    %21 = arith.select %19, %20, %17 : vector<1x128xi1>, vector<1x128xf32>
    %cst_10 = arith.constant 0.000000e+00 : f32
    %22 = vector.broadcast %cst_10 : f32 to vector<1x128xf32>
    %23 = arith.cmpf ogt, %21, %22 : vector<1x128xf32>
    %cst_11 = arith.constant 1.000000e+00 : f32
    %24 = vector.broadcast %cst_11 : f32 to vector<1x128xf32>
    %25 = arith.select %23, %21, %24 : vector<1x128xi1>, vector<1x128xf32>
    %cst_12 = arith.constant 1.000000e+00 : f32
    %26 = vector.broadcast %cst_12 : f32 to vector<8x128xf32>
    %27 = arith.cmpf oeq, %1, %26 : vector<8x128xf32>
    %28 = arith.extui %27 : vector<8x128xi1> to vector<8x128xi32>
    %29 = arith.sitofp %28 : vector<8x128xi32> to vector<8x128xf32>
    %cst_13 = arith.constant dense<0.000000e+00> : vector<128xf32>
    %30 = vector.multi_reduction <add>, %29, %cst_13 [0] : vector<8x128xf32> to vector<128xf32>
    %31 = vector.shape_cast %30 : vector<128xf32> to vector<1x128xf32>
    %cst_14 = arith.constant 0.000000e+00 : f32
    %32 = vector.broadcast %cst_14 : f32 to vector<1x128xf32>
    %33 = arith.cmpf oeq, %31, %32 : vector<1x128xf32>
    %cst_15 = arith.constant 1.000000e+00 : f32
    %34 = vector.broadcast %cst_15 : f32 to vector<1x128xf32>
    %35 = arith.divf %34, %31 : vector<1x128xf32>
    %cst_16 = arith.constant 0.000000e+00 : f32
    %36 = vector.broadcast %cst_16 : f32 to vector<1x128xf32>
    %37 = arith.select %33, %36, %35 : vector<1x128xi1>, vector<1x128xf32>
    %cst_17 = arith.constant 1.000000e+00 : f32
    %38 = vector.broadcast %cst_17 : f32 to vector<1x128xf32>
    %39 = arith.divf %38, %25 : vector<1x128xf32>
    %40 = vector.broadcast %39 : vector<1x128xf32> to vector<8x128xf32>
    %41 = arith.mulf %0, %40 : vector<8x128xf32>
    %42 = arith.negf %41 : vector<8x128xf32>
    %43 = math.exp %42 : vector<8x128xf32>
    %cst_18 = arith.constant 1.000000e+00 : f32
    %44 = vector.broadcast %cst_18 : f32 to vector<8x128xf32>
    %45 = arith.addf %44, %43 : vector<8x128xf32>
    %46 = arith.divf %44, %45 : vector<8x128xf32>
    %cst_19 = arith.constant 1.000000e-10 : f32
    %47 = vector.broadcast %cst_19 : f32 to vector<8x128xf32>
    %48 = arith.addf %46, %47 : vector<8x128xf32>
    %49 = math.log %48 : vector<8x128xf32>
    %50 = arith.mulf %49, %29 : vector<8x128xf32>
    %cst_20 = arith.constant dense<0.000000e+00> : vector<128xf32>
    %51 = vector.multi_reduction <add>, %50, %cst_20 [0] : vector<8x128xf32> to vector<128xf32>
    %52 = vector.shape_cast %51 : vector<128xf32> to vector<1x128xf32>
    %53 = arith.mulf %52, %37 : vector<1x128xf32>
    %cst_21 = arith.constant dense<0.000000e+00> : vector<128xf32>
    %54 = vector.multi_reduction <add>, %46, %cst_21 [0] : vector<8x128xf32> to vector<128xf32>
    %55 = vector.shape_cast %54 : vector<128xf32> to vector<1x128xf32>
    %cst_22 = arith.constant 8.000000e+00 : f32
    %56 = vector.broadcast %cst_22 : f32 to vector<1x128xf32>
    %57 = arith.subf %56, %55 : vector<1x128xf32>
    %cst_23 = arith.constant 1.250000e-01 : f32
    %58 = vector.broadcast %cst_23 : f32 to vector<1x128xf32>
    %59 = arith.mulf %57, %58 : vector<1x128xf32>
    %cst_24 = arith.constant 1.000000e+00 : f32
    %60 = vector.broadcast %cst_24 : f32 to vector<1x128xf32>
    %61 = arith.subf %60, %59 : vector<1x128xf32>
    %62 = arith.mulf %61, %61 : vector<1x128xf32>
    %cst_25 = arith.constant 8.000000e-10 : f32
    %63 = vector.broadcast %cst_25 : f32 to vector<1x128xf32>
    %64 = arith.addf %55, %63 : vector<1x128xf32>
    %cst_26 = arith.constant 1.250000e-01 : f32
    %65 = vector.broadcast %cst_26 : f32 to vector<1x128xf32>
    %66 = arith.mulf %64, %65 : vector<1x128xf32>
    %cst_27 = arith.constant 1.000000e-10 : f32
    %67 = vector.broadcast %cst_27 : f32 to vector<1x128xf32>
    %68 = arith.addf %66, %67 : vector<1x128xf32>
    %69 = math.log %68 : vector<1x128xf32>
    %70 = arith.mulf %69, %62 : vector<1x128xf32>
    %71 = arith.subf %70, %53 : vector<1x128xf32>
    %c0_28 = arith.constant 0 : index
    %c0_29 = arith.constant 0 : index
    %72 = vector.load %arg3[%c0_28, %c0_29] : memref<1x128xf32, #tpu.memory_space<vmem>>, vector<1x128xf32>
    tpu.vector_store %arg3[%c0_28, %c0_29], %71 {strides = array<i32>} : memref<1x128xf32, #tpu.memory_space<vmem>>, vector<1x128xf32>,
    return
  }
  func.func @transform_0(%arg0: i32) -> (i32, i32) {
    %c0_i32 = arith.constant 0 : i32
    %c0_i32_0 = arith.constant 0 : i32
    return %c0_i32, %arg0 : i32, i32
  }
  func.func @transform_1(%arg0: i32) -> (i32, i32) {
    %c0_i32 = arith.constant 0 : i32
    %c0_i32_0 = arith.constant 0 : i32
    return %c0_i32, %arg0 : i32, i32
  }
  func.func @transform_2(%arg0: i32) -> (i32, i32) {
    %c0_i32 = arith.constant 0 : i32
    %c0_i32_0 = arith.constant 0 : i32
    return %c0_i32, %arg0 : i32, i32
  }
}

</mosaic_0001>

<bundles_post_ra>
// kernel: tpu_custom_call.1
= control target key start
LH: loop header
LB: loop body
LE: loop exit
PB: predicated region body
PF: predicated region fallthrough
CT: control target
= control target key end

     0   :  { %7 = vsyncpa [#allocation3], 0  ;;  %s825_s0 = inlined_call_operand.hbm [shape: f32[8,256], index: 0, kind: input, shape index: {}]   ;;  %s826_s1 = inlined_call_operand.hbm [shape: f32[8,256], index: 1, kind: input, shape index: {}]   ;;  %s827_s2 = inlined_call_operand.hbm [shape: f32[1,256], index: 2, kind: output, shape index: {}]  }
   0x1   :  { %9 = vsyncpa [#allocation3 + $0x1], 0 }
   0x2   :  { %10 = vsyncpa [#allocation6], 0 }
   0x3   :  { %12 = vsyncpa [#allocation6 + $0x1], 0 }
   0x4   :  { %13 = vsyncpa [#allocation4], 0 }
   0x5   :  { %15 = vsyncpa [#allocation4 + $0x1], 0  ;;  %s612_s9 = smov 0   ;;  %s614_s10 = smov 0  }
   0x6   :  { %s616_s11 = smov 0   ;;  %s618_s12 = smov 0  }
   0x7 LB: > { %s633_s13 = sadd.s32 4294967295, %s591_s12   ;;  %s380_s14 = sadd.s32 4294967294, %s591_s12   ;;  %s591_s12 = sphi %s618_s12, %s846_s12   ;;  %s587_s11 = sphi %s616_s11, %s845_s11   ;;  %s583_s10 = sphi %s614_s10, %s844_s10   ;;  %s579_s9 = sphi %s612_s9, %s843_s9  }
   0x8   : > { %s637_s15 = sadd.s32 1, %s591_s12   ;;  %s28_s16 = sadd.s32 1, %s587_s11 }
   0x9   : > { %s25_s17 = ssub.s32 %s591_s12, %s637_s15  ;;  %p35_p0 = scmp.ne.s32.totalorder %s587_s11, %s583_s10 }
   0xa   : > { %p26_p1 = scmp.eq.s32.totalorder %s25_s17, 0  ;;  %p36_p2 = scmp.eq.s32.totalorder %s591_s12, 0 }
   0xb   : > { %p41_p3 = scmp.ne.s32.totalorder %s583_s10, %s579_s9  ;;  %p42_p4 = scmp.eq.s32.totalorder %s633_s13, 0 }
   0xc   : > { %s649_s18 = scalar_select %p26_p1, %s587_s11, %s28_s16  }
   0xd   : > { %p651_p5 = por %p36_p2, %p35_p0  ;;  %p655_p6 = por %p42_p4, %p41_p3 }
   0xe   : > { %p91_p7 = scmp.eq.s32.totalorder %s633_s13, 1  ;;  %p97_p8 = scmp.eq.s32.totalorder %s380_s14, 1 }
   0xf   : > { %s831_s20 = scalar_select %p655_p6, 1, 0 }
  0x10   : > { %p412_p10 = scmp.lt.s32.totalorder %s591_s12, 2  ;;  %p662_p11 = por %p91_p7, %p35_p0 }
  0x11   : > { %p666_p12 = por %p97_p8, %p41_p3  ;;  %s671_s23 = sand.u32 1, %s587_s11  }
  0x12   : > { %s832_s21 = scalar_select %p662_p11, 1, 0 }
  0x13   : > { %s833_s22 = scalar_select %p666_p12, 1, 0 }
  0x14   : > { %s384_s24 = sshll.u32 %s591_s12, 7  ;;  %s383_s25 = sshll.u32 %s671_s23, 3 }
  0x15   : > { %s680_s28 = scalar_lea.hbm %s825_s0, %s384_s24  ;;  %s121_s29 = scalar_lea.vmem [#allocation2], %s383_s25 }
  0x16   : > { %s128_s30 = sshll.u32 %s121_s29, 4  ;;  %p686_p13 = pnand %p412_p10, %p651_p5  ;;  %s690_s30 = int_to_ptr.vmem [resolvable:$true] %s128_s30 }
  0x17   : > { %s118_s4 = scalar_lea.sflag [#allocation3], %s671_s23  ;;  %s461_s5 = scalar_lea.hbm %s680_s28, 128 }
  0x18   : > { %p462_p2 = scmp.ne.s32.totalorder %s680_s28, %s461_s5  ;;  %p463_p3 = pneg %p686_p13 }
  0x19   : > { %s466_s8 = scalar_lea.hbm %s825_s0, 256  ;;  %p467_p5 = scmp.lt.u32.totalorder %s680_s28, %s825_s0 }
  0x1a   : > { %p464_p4 = pnand %p463_p3, %p462_p2  ;;  %p468_p8 = scmp.lt.u32.totalorder %s466_s8, %s461_s5 }
  0x1b   : > { %p470_p9 = scmp.lt.u32.totalorder %s461_s5, %s680_s28 }
  0x1c   : > { %p465_p7 = pneg %p464_p4  ;;  %p469_p10 = por %p468_p8, %p467_p5 }
  0x1e   : > { %p471_p0 = por %p470_p9, %p469_p10 }
  0x20   : > { %p472_p1 = pnand %p471_p0, %p465_p7 }
  0x22   : > { %475 = shalt.err (!%p472_p1)
}
  0x23   : > { %s476_s17 = scalar_lea.vmem %s690_s30, 128  ;;  %s593_s19 = smov [#allocation2]  }
  0x24   : > { %p477_p2 = scmp.ne.s32.totalorder %s690_s30, %s476_s17  ;;  %s481_s26 = sshll.u32 %s593_s19, 4  ;;  %s482_s26 = int_to_ptr.vmem [resolvable:$false] %s481_s26 }
  0x25   : > { %s483_s27 = scalar_lea.vmem %s482_s26, 256  ;;  %p484_p11 = scmp.lt.s32.totalorder %s690_s30, %s482_s26 }
  0x26   : > { %p479_p4 = pnand %p477_p2, %p463_p3  ;;  %p485_p5 = scmp.lt.s32.totalorder %s483_s27, %s476_s17 }
  0x28   : > { %p480_p12 = pneg %p479_p4  ;;  %p486_p8 = por %p485_p5, %p484_p11 }
  0x2a   : > { %p487_p9 = pnand %p486_p8, %p480_p12 }
  0x2c   : > { %490 = shalt.err (!%p487_p9)
}
  0x2d   : > { %404 = dma.hbm_to_vmem [thread:$0]  (!%p686_p13), %s680_s28, 128, %s690_s30, %s118_s4  }
  0x2e   : > { %p835_p0 = scmp.lt.s32.totalorder %s591_s12, 3  ;;  %p836_p1 = scmp.ge.s32.totalorder %s591_s12, 1 }
  0x2f   : > { %s733_s7 = scalar_lea.hbm %s826_s1, %s384_s24  ;;  %s139_s8 = scalar_lea.vmem [#allocation5], %s383_s25 }
  0x30   : > { %p724_p7 = pnand %p836_p1, %p835_p0  ;;  %s146_s14 = sshll.u32 %s139_s8, 4  ;;  %s147_s14 = int_to_ptr.vmem [resolvable:$true] %s146_s14 }
  0x31   : > { %s136_s28 = scalar_lea.sflag [#allocation6], %s671_s23  ;;  %s491_s30 = scalar_lea.hbm %s733_s7, 128 }
  0x32   : > { %s837_s29 = scalar_select %p724_p7, 1, 0 }
  0x33   : > { %p492_p11 = scmp.ne.s32.totalorder %s733_s7, %s491_s30  ;;  %s496_s24 = scalar_lea.hbm %s826_s1, 256 }
  0x34   : > { %p497_p2 = scmp.lt.u32.totalorder %s733_s7, %s826_s1  ;;  %p498_p4 = scmp.lt.u32.totalorder %s496_s24, %s491_s30 }
  0x35   : > { %p494_p12 = pnand %p492_p11, %p463_p3  ;;  %p500_p8 = scmp.lt.u32.totalorder %s491_s30, %s733_s7 }
  0x36   : > { %p499_p5 = por %p498_p4, %p497_p2 }
  0x37   : > { %p495_p10 = pneg %p494_p12 }
  0x38   : > { %p501_p9 = por %p500_p8, %p499_p5 }
  0x3a   : > { %p502_p0 = pnand %p501_p9, %p495_p10 }
  0x3c   : > { %505 = shalt.err (!%p502_p0)
}
  0x3d   : > { %s506_s23 = scalar_lea.vmem %s147_s14, 128  ;;  %s594_s25 = smov [#allocation5]  }
  0x3e   : > { %p507_p1 = scmp.ne.s32.totalorder %s147_s14, %s506_s23  ;;  %s511_s26 = sshll.u32 %s594_s25, 4  ;;  %s512_s26 = int_to_ptr.vmem [resolvable:$false] %s511_s26 }
  0x3f   : > { %s513_s27 = scalar_lea.vmem %s512_s26, 256  ;;  %p514_p6 = scmp.lt.s32.totalorder %s147_s14, %s512_s26 }
  0x40   : > { %p509_p11 = pnand %p507_p1, %p463_p3  ;;  %p515_p7 = scmp.lt.s32.totalorder %s513_s27, %s506_s23 }
  0x42   : > { %p510_p12 = pneg %p509_p11  ;;  %p516_p2 = por %p515_p7, %p514_p6 }
  0x44   : > { %p517_p4 = pnand %p516_p2, %p510_p12 }
  0x46   : > { %520 = shalt.err (!%p517_p4)
}
  0x47   : > { %407 = dma.hbm_to_vmem [thread:$0]  (!%p686_p13), %s733_s7, 128, %s147_s14, %s136_s28  }
  0x48   : > { %p838_p10 = scmp.ne.s32.totalorder %s837_s29, 0 }
  0x49   : > { %s760_s5 = sand.u32 (!%p838_p10), 1, %s583_s10   ;;  %p839_p3 = scmp.ne.s32.totalorder (!%p838_p10), %s831_s20, 0 }
  0x4a   : > { %155 = sbr.rel (%p838_p10) target bundleno = 214 (0xd6), region = 28  ;;  %s388_s6 = sshll.u32 (!%p838_p10), %s760_s5, 3 }
  0x4b   : > { %s158_s8 = scalar_lea.sflag (!%p838_p10), [#allocation3], %s760_s5  ;;  %s161_s30 = scalar_lea.vmem (!%p838_p10), [#allocation2], %s388_s6 }
  0x51   : > { %566 = dma.done.wait (%p839_p3), %s158_s8, 128  }
  0x52   : > { %568 = vsyncadd (%p839_p3), %s158_s8, 4294967168  ;;  %s167_s3 = scalar_lea.sflag [#allocation6], %s760_s5  ;;  %s769_s7 = scalar_lea.vmem [#allocation5], %s388_s6 }
  0x53   : > { %570 = dma.done.wait (%p839_p3), %s167_s3, 128  }
  0x54   : > { %572 = vsyncadd (%p839_p3), %s167_s3, 4294967168  ;;  %v195_v0 = vld [vmem:[%s161_s30] sm:$0xff]  ;;  %v196_v30 = vld [vmem:[%s769_s7] sm:$0xff]  ;;  %v595_v32 = vmov 0.0   ;;  %s194_s20 = scalar_lea.vmem [#allocation7], %s760_s5  ;;  %s392_s14 = sshll.u32 %s633_s13, 4 }
  0x55   : > { %v197_v1 = vrot.slane %v195_v0, 4  ;;  %v203_v2 = vmul.f32 %v195_v0, %v195_v0  ;;  %vm227_vm4 = vcmp.eq.f32.partialorder %v196_v30, 1.0  ;;  %s291_s29 = sshll.u32 %s194_s20, 4  ;;  %s783_s16 = scalar_lea.hbm %s827_s2, %s392_s14  ;;  %s778_s29 = int_to_ptr.vmem [resolvable:$true] %s291_s29 }
  0x56   : > { %v390_v33 = vsel %vm227_vm4, 1.0, %v595_v32  ;;  %s279_s24 = scalar_lea.sflag [#allocation4], %s760_s5  ;;  %s521_s17 = scalar_lea.vmem %s778_s29, 16 }
  0x57   : > { %v198_v3 = vadd.f32 %v197_v1, %v195_v0  ;;  %v204_v4 = vrot.slane %v203_v2, 4  ;;  %v230_v35 = vrot.slane %v390_v33, 4  ;;  %p522_p6 = scmp.ne.s32.totalorder %s778_s29, %s521_s17  ;;  %p840_p13 = scmp.ne.s32.totalorder %s832_s21, 0 }
  0x58   : > { %s596_s13 = smov [#allocation7]  }
  0x59   : > { %v199_v5 = vrot.slane %v198_v3, 2  ;;  %v205_v6 = vadd.f32 %v204_v4, %v203_v2  ;;  %v231_v36 = vadd.f32 %v390_v33, %v230_v35  ;;  %p523_p7 = pnand %p522_p6, %p840_p13  ;;  %s525_s19 = sshll.u32 %s596_s13, 4  ;;  %s526_s19 = int_to_ptr.vmem [resolvable:$false] %s525_s19 }
  0x5a   : > { %s527_s23 = scalar_lea.vmem %s526_s19, 32  ;;  %p528_p8 = scmp.lt.s32.totalorder %s778_s29, %s526_s19 }
  0x5b   : > { %v200_v7 = vadd.f32 %v199_v5, %v198_v3  ;;  %v206_v8 = vrot.slane %v205_v6, 2  ;;  %v232_v37 = vrot.slane %v231_v36, 2  ;;  %p524_p5 = pneg %p523_p7  ;;  %p529_p9 = scmp.lt.s32.totalorder %s527_s23, %s521_s17 }
  0x5d   : > { %v201_v9 = vrot.slane %v200_v7, 1  ;;  %v207_v10 = vadd.f32 %v206_v8, %v205_v6  ;;  %v233_v41 = vadd.f32 %v232_v37, %v231_v36  ;;  %p530_p0 = por %p529_p9, %p528_p8 }
  0x5f   : > { %v202_v11 = vadd.f32 %v201_v9, %v200_v7  ;;  %v208_v12 = vrot.slane %v207_v10, 1  ;;  %v234_v44 = vrot.slane %v233_v41, 1  ;;  %p531_p1 = pnand %p530_p0, %p524_p5 }
  0x61   : > { %v209_v13 = vadd.f32 %v208_v12, %v207_v10  ;;  %v210_v14 = vmul.f32 0.125, %v202_v11  ;;  %v235_v47 = vadd.f32 %v234_v44, %v233_v41 }
  0x63   : > { %v211_v15 = vmul.f32 0.125, %v209_v13  ;;  %v212_v16 = vmul.f32 %v210_v14, %v210_v14  ;;  %vm236_vm5 = vcmp.eq.f32.partialorder %v235_v47, 0.0 }
  0x65   : > { %v213_v17 = vsub.f32 %v211_v15, %v212_v16 }
  0x67   : > { %v214_v18 = vmax.f32 %v213_v17, 0.0 }
  0x69   : > { %447 = vrsqrt.f32 %v214_v18  ;;  %vm217_vm0 = vcmp.eq.f32.partialorder %v214_v18, inf  ;;  %v220_v20 = vand.u32 2147483648, %v214_v18  ;;  %vm219_vm1 = vcmp.eq.f32.partialorder %v214_v18, 0.0 }
  0x73   : > { %v448_v19 = vpop.eup %447 }
  0x74   : > { %v216_v21 = vmul.f32 %v448_v19, %v214_v18 }
  0x76   : > { %v218_v22 = vsel %vm217_vm0, %v214_v18, %v216_v21 }
  0x77   : > { %v221_v23 = vsel %vm219_vm1, %v220_v20, %v218_v22 }
  0x78   : > { %v222_v24 = vmul.f32 0.5, %v221_v23 }
  0x7a   : > { %vm223_vm2 = vcmp.gt.f32.partialorder %v222_v24, 1.0 }
  0x7b   : > { %v224_v25 = vsel %vm223_vm2, 1.0, %v222_v24 }
  0x7c   : > { %vm225_vm3 = vcmp.gt.f32.partialorder %v224_v25, 0.0 }
  0x7d   : > { %v226_v26 = vsel %vm225_vm3, %v224_v25, 1.0 }
  0x7e   : > { %449 = vrcp.f32 %v226_v26 }
  0x88   : > { %v450_v27 = vpop.eup %449 }
  0x89   : > { %v242_v28 = vmul.f32 %v450_v27, %v195_v0 }
  0x8b   : > { %v391_v29 = vmul.f32 -1.442695, %v242_v28 }
  0x8d   : > { %451 = vpow2.f32 %v391_v29 }
  0x97   : > { %v452_v31 = vpop.eup %451 }
  0x98   : > { %v246_v34 = vadd.f32 1.0, %v452_v31 }
  0x9a   : > { %453 = vrcp.f32 %v246_v34 }
  0xa4   : > { %v454_v38 = vpop.eup %453 }
  0xa5   : > { %v249_v39 = vadd.f32 1e-10, %v454_v38  ;;  %v260_v40 = vrot.slane %v454_v38, 4 }
  0xa7   : > { %455 = vlog2.f32 %v249_v39  ;;  %v261_v42 = vadd.f32 %v454_v38, %v260_v40 }
  0xa8   : > { %457 = vrcp.f32 %v235_v47 }
  0xa9   : > { %v262_v43 = vrot.slane %v261_v42, 2 }
  0xab   : > { %v263_v45 = vadd.f32 %v262_v43, %v261_v42 }
  0xad   : > { %v264_v46 = vrot.slane %v263_v45, 1 }
  0xaf   : > { %v265_v48 = vadd.f32 %v264_v46, %v263_v45 }
  0xb1   : > { %v456_v49 = vpop.eup %455  ;;  %v270_v50 = vadd.f32 8e-10, %v265_v48  ;;  %v266_v54 = vsub.f32 8.0, %v265_v48 }
  0xb2   : > { %v251_v51 = vmul.f32 0.6931472, %v456_v49  ;;  %v458_v60 = vpop.eup %457 }
  0xb3   : > { %v271_v52 = vmul.f32 0.125, %v270_v50  ;;  %v267_v58 = vmul.f32 0.125, %v266_v54  ;;  %v239_v0 = vsel %vm236_vm5, 0.0, %v458_v60 }
  0xb4   : > { %v252_v53 = vmul.f32 %v390_v33, %v251_v51 }
  0xb5   : > { %v272_v55 = vadd.f32 1e-10, %v271_v52  ;;  %v268_v62 = vsub.f32 1.0, %v267_v58 }
  0xb6   : > { %v253_v56 = vrot.slane %v252_v53, 4 }
  0xb7   : > { %459 = vlog2.f32 %v272_v55  ;;  %v269_v2 = vmul.f32 %v268_v62, %v268_v62 }
  0xb8   : > { %v254_v57 = vadd.f32 %v253_v56, %v252_v53 }
  0xba   : > { %v255_v59 = vrot.slane %v254_v57, 2 }
  0xbc   : > { %v256_v61 = vadd.f32 %v255_v59, %v254_v57 }
  0xbe   : > { %v257_v63 = vrot.slane %v256_v61, 1 }
  0xc0   : > { %v258_v1 = vadd.f32 %v257_v63, %v256_v61 }
  0xc1   : > { %v460_v3 = vpop.eup %459 }
  0xc2   : > { %v259_v4 = vmul.f32 %v258_v1, %v239_v0  ;;  %v274_v5 = vmul.f32 0.6931472, %v460_v3 }
  0xc4   : > { %v275_v6 = vmul.f32 %v274_v5, %v269_v2 }
  0xc6   : > { %v276_v7 = vsub.f32 %v275_v6, %v259_v4 }
  0xc8   : > { %277 = vst [vmem:[%s194_s20] sm:$0x1] %v276_v7 }
  0xc9   : > { %534 = shalt.err (!%p531_p1)
}
  0xca   : > { %s535_s25 = scalar_lea.hbm %s783_s16, 16  ;;  %s539_s5 = scalar_lea.hbm %s827_s2, 32 }
  0xcb   : > { %p536_p11 = scmp.ne.s32.totalorder %s783_s16, %s535_s25  ;;  %p540_p4 = scmp.lt.u32.totalorder %s783_s16, %s827_s2 }
  0xcc   : > { %p541_p10 = scmp.lt.u32.totalorder %s539_s5, %s535_s25  ;;  %p543_p6 = scmp.lt.u32.totalorder %s535_s25, %s783_s16 }
  0xcd   : > { %p537_p12 = pnand %p536_p11, %p840_p13 }
  0xce   : > { %p542_p3 = por %p541_p10, %p540_p4 }
  0xcf   : > { %p538_p2 = pneg %p537_p12 }
  0xd0   : > { %p544_p7 = por %p543_p6, %p542_p3 }
  0xd2   : > { %p545_p5 = pnand %p544_p7, %p538_p2 }
  0xd4   : > { %548 = shalt.err (!%p545_p5)
}
  0xd5   : > { %399 = dma.vmem_to_hbm [thread:$0]  (%p840_p13), %s778_s29, 16, %s783_s16, %s279_s24  }
  0xd6 PF: > { %s303_s30 = sand.u32 1, %s579_s9   ;;  %p841_p8 = scmp.ne.s32.totalorder %s833_s22, 0 }
  0xd7   : > { %p842_p9 = scmp.ge.s32.totalorder %s591_s12, 2  ;;  %s304_s3 = scalar_lea.sflag [#allocation4], %s303_s30 }
  0xd9   : > { %p409_p0 = pnand %p842_p9, %p841_p8 }
  0xdb   : > { %574 = dma.done.wait (!%p409_p0), %s304_s3, 16  }
  0xdc   : > { %576 = vsyncadd (!%p409_p0), %s304_s3, 4294967280  ;;  %p18_p1 = scmp.ge.s32.totalorder %s637_s15, 4   ;;  %s843_s9 = smov %s583_s10 }
  0xdd   : > { %s844_s10 = smov %s587_s11  ;;  %s845_s11 = smov %s649_s18 }
  0xde   : > { %s846_s12 = smov %s637_s15  ;;  %20 = sbr.rel (!%p18_p1) target bundleno = 7 (0x7), region = 86 }
  0xe5   :  { %308 = vsyncpa [#allocation3], 1 }
  0xe6   :  { %310 = vsyncpa [#allocation3 + $0x1], 1 }
  0xe7   :  { %311 = vsyncpa [#allocation6], 1 }
  0xe8   :  { %313 = vsyncpa [#allocation6 + $0x1], 1 }
  0xe9   :  { %314 = vsyncpa [#allocation4], 1 }
  0xea   :  { %316 = vsyncpa [#allocation4 + $0x1], 1 }

</bundles_post_ra>
